<compile_context>
chip_gen: v7x
topology: tpu7x:2x2x1
jax: 0.10.0
libtpu: 0.0.40
codegen_flags: <defaults>
</compile_context>

<pallas_src>
import functools
import math

import jax
import jax.numpy as jnp
from jax.experimental import pallas as pl
from jax.experimental.pallas import tpu as pltpu


# -----------------------------------------------------------------------------
# Kernel
# -----------------------------------------------------------------------------
def _clip_layer_kernel(
    x_ref, bias_ref,
    ln1_g_ref, ln1_b_ref,
    wqkv_ref, bqkv_ref,
    wo_ref, bo_ref,
    ln2_g_ref, ln2_b_ref,
    w1_ref, b1_ref,
    w2_ref, b2_ref,
    o_ref,
    *, n_head: int, seq_len: int, softmax_bf16: bool,
):
    R, E = x_ref.shape              # R = Bt * S rows in this block
    S = seq_len
    Bt = R // S
    H = n_head
    Dh = E // H
    eps = 1e-5

    def layernorm(v, g, b):
        mu = jnp.mean(v, axis=-1, keepdims=True)
        var = jnp.mean((v - mu) ** 2, axis=-1, keepdims=True)
        return (v - mu) * jax.lax.rsqrt(var + eps) * g + b

    # ---- attention block -----------------------------------------------------
    h = layernorm(x_ref[...], ln1_g_ref[...], ln1_b_ref[...])

    # Fused QKV projection: bf16 MXU matmul, f32 accumulation.
    # (softmax scale already folded into the Q weights/bias by the wrapper)
    qkv = jnp.dot(h.astype(jnp.bfloat16), wqkv_ref[...],
                  preferred_element_type=jnp.float32) + bqkv_ref[...]

    # Head split via sublane (row) concat -> leading batch dim (H*Bt).
    # QK^T / PV then run as single batched dot_generals.
    def heads(col0):
        parts = [qkv[:, col0 + i * Dh: col0 + (i + 1) * Dh] for i in range(H)]
        return jnp.concatenate(parts, axis=0).reshape(H * Bt, S, Dh)

    qh = heads(0).astype(jnp.bfloat16)
    kh = heads(E).astype(jnp.bfloat16)
    vh = heads(2 * E).astype(jnp.bfloat16)

    sc = jnp.einsum('bqd,bkd->bqk', qh, kh,
                    preferred_element_type=jnp.float32)        # (H*Bt, S, S) f32
    # Additive causal mask (f32) and f32 max-subtraction keep exp() safe even
    # when the probabilities themselves are computed in bf16.
    sc = sc + bias_ref[...]
    sc = sc - jnp.max(sc, axis=-1, keepdims=True)

    if softmax_bf16:
        # v6e / v7x: bf16 EUP/VPU; halves the largest attention temporary.
        p = jnp.exp(sc.astype(jnp.bfloat16))
        denom = jnp.sum(p, axis=-1, keepdims=True, dtype=jnp.float32)
    else:
        p32 = jnp.exp(sc)
        denom = jnp.sum(p32, axis=-1, keepdims=True)
        p = p32.astype(jnp.bfloat16)

    ctx = jnp.einsum('bqk,bkd->bqd', p, vh,
                     preferred_element_type=jnp.float32)        # (H*Bt, S, Dh)
    # Normalize after PV: S*Dh multiplies instead of S*S, reciprocal on EUP.
    ctx = ctx * pl.reciprocal(denom, approx=True)

    # Back to (R, E): per-head lane concat.
    ctx = ctx.reshape(H, R, Dh)
    attn = jnp.concatenate([ctx[i] for i in range(H)], axis=-1)  # (R, E) f32

    attn = jnp.dot(attn.astype(jnp.bfloat16), wo_ref[...],
                   preferred_element_type=jnp.float32) + bo_ref[...]
    x2 = attn + x_ref[...]          # residual: re-read x_ref (shorter live range)

    # ---- MLP block -------------------------------------------------------------
    h2 = layernorm(x2, ln2_g_ref[...], ln2_b_ref[...])
    m = jnp.dot(h2.astype(jnp.bfloat16), w1_ref[...],
                preferred_element_type=jnp.float32) + b1_ref[...]
    m = m * jax.nn.sigmoid(1.702 * m)                 # QuickGELU (EUP)
    m = jnp.dot(m.astype(jnp.bfloat16), w2_ref[...],
                preferred_element_type=jnp.float32) + b2_ref[...]

    o_ref[...] = m + x2


# -----------------------------------------------------------------------------
# Generation-aware sizing helpers
# -----------------------------------------------------------------------------
def _tpu_config():
    """Physical VMEM, MXU-fill target rows, TensorCore count, bf16-softmax flag."""
    kind = ""
    try:
        dev = jax.devices()[0]
        if dev.platform == "tpu":
            kind = dev.device_kind.lower()
    except Exception:
        pass

    if "v5e" in kind or "v5 lite" in kind or "v5lite" in kind:
        phys, rows, cores, sm_bf16 = 128 << 20, 256, 1, False   # 128-wide MXU
    elif "v6" in kind:
        phys, rows, cores, sm_bf16 = 128 << 20, 512, 1, True    # 256-wide MXU
    elif "v7" in kind:
        phys, rows, cores, sm_bf16 = 64 << 20, 512, 2, True     # 64 MiB / TC
    elif "v5p" in kind or "v5" in kind or "v4" in kind or "v3" in kind:
        phys, rows, cores, sm_bf16 = 128 << 20, 256, 2, False
    else:
        # Unknown / future chip: conservative (v7x-like) assumptions.
        phys, rows, cores, sm_bf16 = 64 << 20, 512, 2, True

    try:  # refine physical VMEM if the runtime exposes it
        info_vmem = int(pltpu.get_tpu_info().vmem_capacity_bytes)
        if info_vmem > (8 << 20):
            phys = info_vmem
    except Exception:
        pass

    return dict(physical_vmem=phys, target_rows=rows, n_cores=cores,
                softmax_bf16=sm_bf16)


def _estimate_vmem_bytes(rows, S, E, H, weight_bytes, softmax_bf16):
    """Rough per-grid-step VMEM footprint of the fused body (used as a guard)."""
    f32, bf16 = 4, 2
    hb = H * max(rows // S, 1)
    est = 0
    est += 2 * (2 * rows * E * f32)              # x in + out, double-buffered
    est += weight_bytes                          # weights/biases, single-buffered
    est += S * S * f32                           # causal bias, single-buffered
    est += rows * (3 * E) * f32                  # qkv activations
    est += 3 * rows * E * bf16                   # per-head q/k/v bf16 copies
    est += hb * S * S * f32                      # scores (f32, pre-softmax)
    est += hb * S * S * (bf16 if softmax_bf16 else f32)   # exp(scores)
    est += 3 * rows * E * f32                    # attn / residual / ln2 temps
    est += 2 * rows * (4 * E) * f32              # MLP hidden (+ activation)
    return est


def _pick_block_batch(B, S, E, H, weight_bytes, cfg, vmem_cap):
    """Batch elements per grid step under a VMEM guard.

    Single-TC chips (v5e/v6e): largest feasible block (extra grid steps are
    pure serial overhead).  Multi-TC chips (v7x/v5p/v4): prefer >= 2 grid
    steps per core so each core's pipeline overlaps DMA with compute, then
    the smallest block that reaches the MXU-fill target rows.
    """
    cands = [bt for bt in range(1, B + 1)
             if B % bt == 0 and ((bt * S) % 8 == 0 or bt == B)]
    if not cands:
        cands = [B]   # full-array block (legal even if rows not 8-aligned)

    def fits(bt):
        est = _estimate_vmem_bytes(bt * S, S, E, H, weight_bytes,
                                   cfg["softmax_bf16"])
        return int(est * 1.3) + (4 << 20) <= vmem_cap

    feasible = [bt for bt in cands if fits(bt)] or cands[:1]

    if cfg["n_cores"] <= 1:
        return feasible[-1]          # one big block on single-TC chips

    for min_steps in (2 * cfg["n_cores"], cfg["n_cores"], 1):
        pool = [bt for bt in feasible if B // bt >= min_steps]
        if pool:
            break

    for bt in pool:                  # ascending: smallest Bt hitting target rows
        if bt * S >= cfg["target_rows"]:
            return bt
    return pool[-1]


def _const_block_spec(shape):
    """Whole-array block with a constant index; single-buffered since the
    block never changes across grid steps (double-buffering it wastes VMEM)."""
    try:
        return pl.BlockSpec(shape, lambda b: (0, 0), pipeline_mode=pl.Buffered(1))
    except TypeError:                # older jax without pipeline_mode
        return pl.BlockSpec(shape, lambda b: (0, 0))


# -----------------------------------------------------------------------------
# Wrapper
# -----------------------------------------------------------------------------
def clip_layer(x, params, n_head: int):
    """x: (B, S, E) float32; params: dict of pre-transposed f32 weights."""
    B, S, E = x.shape
    scale = 1.0 / math.sqrt(E // n_head)

    # Fold softmax scale into the Q projection (free, host-side); cast the big
    # weight matrices to bf16 for full-rate MXU matmuls. Biases / LN stay f32.
    w_qkv = (params["w_qkv"].astype(jnp.float32)
             .at[:, :E].multiply(scale).astype(jnp.bfloat16))
    b_qkv = params["b_qkv"].astype(jnp.float32).at[:, :E].multiply(scale)
    ordered = [
        params["ln1_g"].astype(jnp.float32), params["ln1_b"].astype(jnp.float32),
        w_qkv, b_qkv,
        params["w_o"].astype(jnp.bfloat16), params["b_o"].astype(jnp.float32),
        params["ln2_g"].astype(jnp.float32), params["ln2_b"].astype(jnp.float32),
        params["w1"].astype(jnp.bfloat16), params["b1"].astype(jnp.float32),
        params["w2"].astype(jnp.bfloat16), params["b2"].astype(jnp.float32),
    ]

    # Causal additive bias, built once on the host (replaces per-step iota work).
    r = jnp.arange(S, dtype=jnp.int32)
    bias = jnp.where(r[None, :] > r[:, None],
                     jnp.float32(-1e30), jnp.float32(0.0))     # (S, S)

    cfg = _tpu_config()
    vmem_cap = max(cfg["physical_vmem"] - (24 << 20), 32 << 20)
    weight_bytes = sum(int(a.size) * a.dtype.itemsize for a in ordered)

    Bt = _pick_block_batch(B, S, E, n_head, weight_bytes, cfg, vmem_cap)
    rows = Bt * S
    grid = (B // Bt,)

    est = _estimate_vmem_bytes(rows, S, E, n_head, weight_bytes,
                               cfg["softmax_bf16"])
    vmem_limit = int(min(vmem_cap, max(int(est * 1.3) + (4 << 20), 32 << 20)))

    x2d = x.reshape(B * S, E).astype(jnp.float32)
    x_spec = pl.BlockSpec((rows, E), lambda b: (b, 0))      # double-buffered
    bias_spec = _const_block_spec((S, S))
    w_specs = [_const_block_spec(p.shape) for p in ordered]

    kernel = functools.partial(_clip_layer_kernel, n_head=n_head, seq_len=S,
                               softmax_bf16=cfg["softmax_bf16"])
    out2d = pl.pallas_call(
        kernel,
        out_shape=jax.ShapeDtypeStruct((B * S, E), jnp.float32),
        grid_spec=pltpu.PrefetchScalarGridSpec(
            num_scalar_prefetch=0,
            grid=grid,
            in_specs=[x_spec, bias_spec] + w_specs,
            out_specs=x_spec,
        ),
        compiler_params=pltpu.CompilerParams(
            dimension_semantics=("parallel",),
            vmem_limit_bytes=vmem_limit,
        ),
    )(x2d, bias, *ordered)
    return out2d.reshape(B, S, E)


# -----------------------------------------------------------------------------
# Pure-JAX f32 reference (mirrors the PyTorch forward) for a correctness check
# -----------------------------------------------------------------------------
def clip_layer_ref(x, p, n_head):
    B, S, E = x.shape
    d_head = E // n_head
    eps = 1e-5

    def ln(v, g, b):
        mu = jnp.mean(v, -1, keepdims=True)
        var = jnp.mean((v - mu) ** 2, -1, keepdims=True)
        return (v - mu) / jnp.sqrt(var + eps) * g + b

    residue = x
    h = ln(x, p["ln1_g"], p["ln1_b"])
    qkv = h @ p["w_qkv"] + p["b_qkv"]
    q, k, v = jnp.split(qkv, 3, axis=-1)
    q = q.reshape(B, S, n_head, d_head).transpose(0, 2, 1, 3)
    k = k.reshape(B, S, n_head, d_head).transpose(0, 2, 1, 3)
    v = v.reshape(B, S, n_head, d_head).transpose(0, 2, 1, 3)
    w = jnp.einsum("bhqd,bhkd->bhqk", q, k)
    mask = jnp.triu(jnp.ones((S, S), bool), 1)
    w = jnp.where(mask, -jnp.inf, w) / math.sqrt(d_head)
    w = jax.nn.softmax(w, axis=-1)
    o = jnp.einsum("bhqk,bhkd->bhqd", w, v).transpose(0, 2, 1, 3).reshape(B, S, E)
    o = o @ p["w_o"] + p["b_o"]
    x = o + residue
    residue = x
    h = ln(x, p["ln2_g"], p["ln2_b"])
    m = h @ p["w1"] + p["b1"]
    m = m * jax.nn.sigmoid(1.702 * m)
    m = m @ p["w2"] + p["b2"]
    return m + residue


# -----------------------------------------------------------------------------
# Main
# -----------------------------------------------------------------------------
if __name__ == "__main__":
    B, S, E, N_HEAD = 2, 8, 32, 4

    key = jax.random.PRNGKey(0)
    ks = jax.random.split(key, 16)

    def rand(k, shape, scale=0.05):
        return (scale * jax.random.normal(k, shape)).astype(jnp.float32)

    # Weights stored transposed relative to nn.Linear.weight, i.e. shape
    # (in_features, out_features), so the kernel does `x @ W + b`.
    params = {
        "ln1_g": 1.0 + rand(ks[0], (1, E)),
        "ln1_b": rand(ks[1], (1, E)),
        "w_qkv": rand(ks[2], (E, 3 * E)),
        "b_qkv": rand(ks[3], (1, 3 * E)),
        "w_o":   rand(ks[4], (E, E)),
        "b_o":   rand(ks[5], (1, E)),
        "ln2_g": 1.0 + rand(ks[6], (1, E)),
        "ln2_b": rand(ks[7], (1, E)),
        "w1":    rand(ks[8], (E, 4 * E)),
        "b1":    rand(ks[9], (1, 4 * E)),
        "w2":    rand(ks[10], (4 * E, E)),
        "b2":    rand(ks[11], (1, E)),
    }

    x = jax.random.normal(ks[12], (B, S, E), dtype=jnp.float32)

    out = jax.block_until_ready(clip_layer(x, params, N_HEAD))
    ref = jax.block_until_ready(clip_layer_ref(x, params, N_HEAD))

    assert out.shape == (B, S, E)
    # Kernel runs its matmuls (and on v6e/v7x the softmax probabilities) in
    # bf16 with f32 accumulation; compare against the f32 reference with a
    # correspondingly relaxed tolerance.
    assert jnp.allclose(out, ref, atol=3e-2, rtol=3e-2), (
        f"max abs err = {jnp.max(jnp.abs(out - ref))}"
    )

    print("KERNEL_OK")
</pallas_src>

<mosaic_0001>
module attributes {stable_mosaic.version = 11 : i64} {
  func.func @_clip_layer_kernel(%arg0: i32, %arg1: memref<8x32xf32, #tpu.memory_space<vmem>>, %arg2: memref<8x8xf32, #tpu.memory_space<vmem>>, %arg3: memref<1x32xf32, #tpu.memory_space<vmem>>, %arg4: memref<1x32xf32, #tpu.memory_space<vmem>>, %arg5: memref<32x96xbf16, #tpu.memory_space<vmem>>, %arg6: memref<1x96xf32, #tpu.memory_space<vmem>>, %arg7: memref<32x32xbf16, #tpu.memory_space<vmem>>, %arg8: memref<1x32xf32, #tpu.memory_space<vmem>>, %arg9: memref<1x32xf32, #tpu.memory_space<vmem>>, %arg10: memref<1x32xf32, #tpu.memory_space<vmem>>, %arg11: memref<32x128xbf16, #tpu.memory_space<vmem>>, %arg12: memref<1x128xf32, #tpu.memory_space<vmem>>, %arg13: memref<128x32xbf16, #tpu.memory_space<vmem>>, %arg14: memref<1x32xf32, #tpu.memory_space<vmem>>, %arg15: memref<8x32xf32, #tpu.memory_space<vmem>>) attributes {dimension_semantics = [#tpu.dimension_semantics<parallel>], iteration_bounds = array<i64: 2>, scalar_prefetch = 0 : i64, scratch_operands = 0 : i64, tpu.core_type = #tpu.core_type<tc>, window_params = [{transform_indices = @transform_0, window_bounds = array<i64: 8, 32>}, {pipeline_mode = #tpu.pipeline_mode<synchronous>, transform_indices = @transform_1, window_bounds = array<i64: 8, 8>}, {pipeline_mode = #tpu.pipeline_mode<synchronous>, transform_indices = @transform_2, window_bounds = array<i64: 1, 32>}, {pipeline_mode = #tpu.pipeline_mode<synchronous>, transform_indices = @transform_3, window_bounds = array<i64: 1, 32>}, {pipeline_mode = #tpu.pipeline_mode<synchronous>, transform_indices = @transform_4, window_bounds = array<i64: 32, 96>}, {pipeline_mode = #tpu.pipeline_mode<synchronous>, transform_indices = @transform_5, window_bounds = array<i64: 1, 96>}, {pipeline_mode = #tpu.pipeline_mode<synchronous>, transform_indices = @transform_6, window_bounds = array<i64: 32, 32>}, {pipeline_mode = #tpu.pipeline_mode<synchronous>, transform_indices = @transform_7, window_bounds = array<i64: 1, 32>}, {pipeline_mode = #tpu.pipeline_mode<synchronous>, transform_indices = @transform_8, window_bounds = array<i64: 1, 32>}, {pipeline_mode = #tpu.pipeline_mode<synchronous>, transform_indices = @transform_9, window_bounds = array<i64: 1, 32>}, {pipeline_mode = #tpu.pipeline_mode<synchronous>, transform_indices = @transform_10, window_bounds = array<i64: 32, 128>}, {pipeline_mode = #tpu.pipeline_mode<synchronous>, transform_indices = @transform_11, window_bounds = array<i64: 1, 128>}, {pipeline_mode = #tpu.pipeline_mode<synchronous>, transform_indices = @transform_12, window_bounds = array<i64: 128, 32>}, {pipeline_mode = #tpu.pipeline_mode<synchronous>, transform_indices = @transform_13, window_bounds = array<i64: 1, 32>}, {transform_indices = @transform_14, window_bounds = array<i64: 8, 32>}]} {
    %c0 = arith.constant 0 : index
    %c0_0 = arith.constant 0 : index
    %0 = vector.load %arg1[%c0, %c0_0] : memref<8x32xf32, #tpu.memory_space<vmem>>, vector<8x32xf32>
    %c0_1 = arith.constant 0 : index
    %c0_2 = arith.constant 0 : index
    %1 = vector.load %arg3[%c0_1, %c0_2] : memref<1x32xf32, #tpu.memory_space<vmem>>, vector<1x32xf32>
    %c0_3 = arith.constant 0 : index
    %c0_4 = arith.constant 0 : index
    %2 = vector.load %arg4[%c0_3, %c0_4] : memref<1x32xf32, #tpu.memory_space<vmem>>, vector<1x32xf32>
    %cst = arith.constant dense<0.000000e+00> : vector<8xf32>
    %3 = vector.multi_reduction <add>, %0, %cst [1] : vector<8x32xf32> to vector<8xf32>
    %4 = vector.shape_cast %3 : vector<8xf32> to vector<8x1xf32>
    %cst_5 = arith.constant 3.200000e+01 : f32
    %5 = vector.broadcast %cst_5 : f32 to vector<8x1xf32>
    %6 = arith.divf %4, %5 : vector<8x1xf32>
    %7 = vector.broadcast %6 : vector<8x1xf32> to vector<8x32xf32>
    %8 = arith.subf %0, %7 : vector<8x32xf32>
    %9 = arith.mulf %8, %8 : vector<8x32xf32>
    %cst_6 = arith.constant dense<0.000000e+00> : vector<8xf32>
    %10 = vector.multi_reduction <add>, %9, %cst_6 [1] : vector<8x32xf32> to vector<8xf32>
    %11 = vector.shape_cast %10 : vector<8xf32> to vector<8x1xf32>
    %cst_7 = arith.constant 3.200000e+01 : f32
    %12 = vector.broadcast %cst_7 : f32 to vector<8x1xf32>
    %13 = arith.divf %11, %12 : vector<8x1xf32>
    %14 = vector.broadcast %6 : vector<8x1xf32> to vector<8x32xf32>
    %15 = arith.subf %0, %14 : vector<8x32xf32>
    %cst_8 = arith.constant 9.99999974E-6 : f32
    %16 = vector.broadcast %cst_8 : f32 to vector<8x1xf32>
    %17 = arith.addf %13, %16 : vector<8x1xf32>
    %18 = math.rsqrt %17 : vector<8x1xf32>
    %19 = vector.broadcast %18 : vector<8x1xf32> to vector<8x32xf32>
    %20 = arith.mulf %15, %19 : vector<8x32xf32>
    %21 = vector.broadcast %1 : vector<1x32xf32> to vector<8x32xf32>
    %22 = arith.mulf %20, %21 : vector<8x32xf32>
    %23 = vector.broadcast %2 : vector<1x32xf32> to vector<8x32xf32>
    %24 = arith.addf %22, %23 : vector<8x32xf32>
    %25 = arith.truncf %24 : vector<8x32xf32> to vector<8x32xbf16>
    %c0_9 = arith.constant 0 : index
    %c0_10 = arith.constant 0 : index
    %26 = vector.load %arg5[%c0_9, %c0_10] : memref<32x96xbf16, #tpu.memory_space<vmem>>, vector<32x96xbf16>
    %cst_11 = arith.constant dense<0.000000e+00> : vector<8x96xf32>
    %27 = tpu.matmul %25, %26, %cst_11 {dimension_numbers = #tpu.dot_dimension_numbers<[1], [0], [0], [1], [0, 0, 1, 1], [], []>} : vector<8x32xbf16>, vector<32x96xbf16>, vector<8x96xf32> -> vector<8x96xf32>
    %c0_12 = arith.constant 0 : index
    %c0_13 = arith.constant 0 : index
    %28 = vector.load %arg6[%c0_12, %c0_13] : memref<1x96xf32, #tpu.memory_space<vmem>>, vector<1x96xf32>
    %29 = vector.broadcast %28 : vector<1x96xf32> to vector<8x96xf32>
    %30 = arith.addf %27, %29 : vector<8x96xf32>
    %31 = vector.extract_strided_slice %30 {offsets = [0, 0], sizes = [8, 8], strides = [1, 1]} : vector<8x96xf32> to vector<8x8xf32>
    %32 = vector.extract_strided_slice %30 {offsets = [0, 8], sizes = [8, 8], strides = [1, 1]} : vector<8x96xf32> to vector<8x8xf32>
    %33 = vector.extract_strided_slice %30 {offsets = [0, 16], sizes = [8, 8], strides = [1, 1]} : vector<8x96xf32> to vector<8x8xf32>
    %34 = vector.extract_strided_slice %30 {offsets = [0, 24], sizes = [8, 8], strides = [1, 1]} : vector<8x96xf32> to vector<8x8xf32>
    %35 = tpu.concatenate %31, %32, %33, %34 in 0 : vector<8x8xf32>, vector<8x8xf32>, vector<8x8xf32>, vector<8x8xf32> -> vector<32x8xf32>
    %36 = vector.shape_cast %35 : vector<32x8xf32> to vector<4x8x8xf32>
    %37 = arith.truncf %36 : vector<4x8x8xf32> to vector<4x8x8xbf16>
    %38 = vector.extract_strided_slice %30 {offsets = [0, 32], sizes = [8, 8], strides = [1, 1]} : vector<8x96xf32> to vector<8x8xf32>
    %39 = vector.extract_strided_slice %30 {offsets = [0, 40], sizes = [8, 8], strides = [1, 1]} : vector<8x96xf32> to vector<8x8xf32>
    %40 = vector.extract_strided_slice %30 {offsets = [0, 48], sizes = [8, 8], strides = [1, 1]} : vector<8x96xf32> to vector<8x8xf32>
    %41 = vector.extract_strided_slice %30 {offsets = [0, 56], sizes = [8, 8], strides = [1, 1]} : vector<8x96xf32> to vector<8x8xf32>
    %42 = tpu.concatenate %38, %39, %40, %41 in 0 : vector<8x8xf32>, vector<8x8xf32>, vector<8x8xf32>, vector<8x8xf32> -> vector<32x8xf32>
    %43 = vector.shape_cast %42 : vector<32x8xf32> to vector<4x8x8xf32>
    %44 = arith.truncf %43 : vector<4x8x8xf32> to vector<4x8x8xbf16>
    %45 = vector.extract_strided_slice %30 {offsets = [0, 64], sizes = [8, 8], strides = [1, 1]} : vector<8x96xf32> to vector<8x8xf32>
    %46 = vector.extract_strided_slice %30 {offsets = [0, 72], sizes = [8, 8], strides = [1, 1]} : vector<8x96xf32> to vector<8x8xf32>
    %47 = vector.extract_strided_slice %30 {offsets = [0, 80], sizes = [8, 8], strides = [1, 1]} : vector<8x96xf32> to vector<8x8xf32>
    %48 = vector.extract_strided_slice %30 {offsets = [0, 88], sizes = [8, 8], strides = [1, 1]} : vector<8x96xf32> to vector<8x8xf32>
    %49 = tpu.concatenate %45, %46, %47, %48 in 0 : vector<8x8xf32>, vector<8x8xf32>, vector<8x8xf32>, vector<8x8xf32> -> vector<32x8xf32>
    %50 = vector.shape_cast %49 : vector<32x8xf32> to vector<4x8x8xf32>
    %51 = arith.truncf %50 : vector<4x8x8xf32> to vector<4x8x8xbf16>
    "tpu.trace_start"() <{level = 10 : i32, message = "bqd,bkd->bqk"}> : () -> ()
    %cst_14 = arith.constant dense<0.000000e+00> : vector<4x8x8xf32>
    %52 = tpu.matmul %37, %44, %cst_14 {dimension_numbers = #tpu.dot_dimension_numbers<[2], [2], [1], [1], [0, 0, 0, 1, 1, 1], [0], [0]>} : vector<4x8x8xbf16>, vector<4x8x8xbf16>, vector<4x8x8xf32> -> vector<4x8x8xf32>
    "tpu.trace_stop"() : () -> ()
    %c0_15 = arith.constant 0 : index
    %c0_16 = arith.constant 0 : index
    %53 = vector.load %arg2[%c0_15, %c0_16] : memref<8x8xf32, #tpu.memory_space<vmem>>, vector<8x8xf32>
    %54 = vector.shape_cast %53 : vector<8x8xf32> to vector<1x8x8xf32>
    %55 = vector.broadcast %54 : vector<1x8x8xf32> to vector<4x8x8xf32>
    %56 = arith.addf %52, %55 : vector<4x8x8xf32>
    %cst_17 = arith.constant dense<0xFF800000> : vector<4x8xf32>
    %57 = vector.multi_reduction <maximumf>, %56, %cst_17 [2] : vector<4x8x8xf32> to vector<4x8xf32>
    %58 = vector.shape_cast %57 : vector<4x8xf32> to vector<4x8x1xf32>
    %59 = vector.broadcast %58 : vector<4x8x1xf32> to vector<4x8x8xf32>
    %60 = arith.subf %56, %59 : vector<4x8x8xf32>
    %61 = arith.truncf %60 : vector<4x8x8xf32> to vector<4x8x8xbf16>
    %62 = math.exp %61 : vector<4x8x8xbf16>
    %63 = arith.extf %62 : vector<4x8x8xbf16> to vector<4x8x8xf32>
    %cst_18 = arith.constant dense<0.000000e+00> : vector<4x8xf32>
    %64 = vector.multi_reduction <add>, %63, %cst_18 [2] : vector<4x8x8xf32> to vector<4x8xf32>
    %65 = vector.shape_cast %64 : vector<4x8xf32> to vector<4x8x1xf32>
    "tpu.trace_start"() <{level = 10 : i32, message = "bqk,bkd->bqd"}> : () -> ()
    %cst_19 = arith.constant dense<0.000000e+00> : vector<4x8x8xf32>
    %66 = tpu.matmul %62, %51, %cst_19 {dimension_numbers = #tpu.dot_dimension_numbers<[2], [1], [1], [2], [0, 0, 0, 1, 1, 2], [0], [0]>} : vector<4x8x8xbf16>, vector<4x8x8xbf16>, vector<4x8x8xf32> -> vector<4x8x8xf32>
    "tpu.trace_stop"() : () -> ()
    %67 = tpu.reciprocal %65 {approx = true} : vector<4x8x1xf32> -> vector<4x8x1xf32>
    %68 = vector.broadcast %67 : vector<4x8x1xf32> to vector<4x8x8xf32>
    %69 = arith.mulf %66, %68 : vector<4x8x8xf32>
    %70 = vector.extract_strided_slice %69 {offsets = [0, 0, 0], sizes = [1, 8, 8], strides = [1, 1, 1]} : vector<4x8x8xf32> to vector<1x8x8xf32>
    %71 = vector.shape_cast %70 : vector<1x8x8xf32> to vector<8x8xf32>
    %72 = vector.extract_strided_slice %69 {offsets = [1, 0, 0], sizes = [1, 8, 8], strides = [1, 1, 1]} : vector<4x8x8xf32> to vector<1x8x8xf32>
    %73 = vector.shape_cast %72 : vector<1x8x8xf32> to vector<8x8xf32>
    %74 = vector.extract_strided_slice %69 {offsets = [2, 0, 0], sizes = [1, 8, 8], strides = [1, 1, 1]} : vector<4x8x8xf32> to vector<1x8x8xf32>
    %75 = vector.shape_cast %74 : vector<1x8x8xf32> to vector<8x8xf32>
    %76 = vector.extract_strided_slice %69 {offsets = [3, 0, 0], sizes = [1, 8, 8], strides = [1, 1, 1]} : vector<4x8x8xf32> to vector<1x8x8xf32>
    %77 = vector.shape_cast %76 : vector<1x8x8xf32> to vector<8x8xf32>
    %78 = tpu.concatenate %71, %73, %75, %77 in 1 : vector<8x8xf32>, vector<8x8xf32>, vector<8x8xf32>, vector<8x8xf32> -> vector<8x32xf32>
    %79 = arith.truncf %78 : vector<8x32xf32> to vector<8x32xbf16>
    %c0_20 = arith.constant 0 : index
    %c0_21 = arith.constant 0 : index
    %80 = vector.load %arg7[%c0_20, %c0_21] : memref<32x32xbf16, #tpu.memory_space<vmem>>, vector<32x32xbf16>
    %cst_22 = arith.constant dense<0.000000e+00> : vector<8x32xf32>
    %81 = tpu.matmul %79, %80, %cst_22 {dimension_numbers = #tpu.dot_dimension_numbers<[1], [0], [0], [1], [0, 0, 1, 1], [], []>} : vector<8x32xbf16>, vector<32x32xbf16>, vector<8x32xf32> -> vector<8x32xf32>
    %c0_23 = arith.constant 0 : index
    %c0_24 = arith.constant 0 : index
    %82 = vector.load %arg8[%c0_23, %c0_24] : memref<1x32xf32, #tpu.memory_space<vmem>>, vector<1x32xf32>
    %83 = vector.broadcast %82 : vector<1x32xf32> to vector<8x32xf32>
    %84 = arith.addf %81, %83 : vector<8x32xf32>
    %c0_25 = arith.constant 0 : index
    %c0_26 = arith.constant 0 : index
    %85 = vector.load %arg1[%c0_25, %c0_26] : memref<8x32xf32, #tpu.memory_space<vmem>>, vector<8x32xf32>
    %86 = arith.addf %84, %85 : vector<8x32xf32>
    %c0_27 = arith.constant 0 : index
    %c0_28 = arith.constant 0 : index
    %87 = vector.load %arg9[%c0_27, %c0_28] : memref<1x32xf32, #tpu.memory_space<vmem>>, vector<1x32xf32>
    %c0_29 = arith.constant 0 : index
    %c0_30 = arith.constant 0 : index
    %88 = vector.load %arg10[%c0_29, %c0_30] : memref<1x32xf32, #tpu.memory_space<vmem>>, vector<1x32xf32>
    %cst_31 = arith.constant dense<0.000000e+00> : vector<8xf32>
    %89 = vector.multi_reduction <add>, %86, %cst_31 [1] : vector<8x32xf32> to vector<8xf32>
    %90 = vector.shape_cast %89 : vector<8xf32> to vector<8x1xf32>
    %cst_32 = arith.constant 3.200000e+01 : f32
    %91 = vector.broadcast %cst_32 : f32 to vector<8x1xf32>
    %92 = arith.divf %90, %91 : vector<8x1xf32>
    %93 = vector.broadcast %92 : vector<8x1xf32> to vector<8x32xf32>
    %94 = arith.subf %86, %93 : vector<8x32xf32>
    %95 = arith.mulf %94, %94 : vector<8x32xf32>
    %cst_33 = arith.constant dense<0.000000e+00> : vector<8xf32>
    %96 = vector.multi_reduction <add>, %95, %cst_33 [1] : vector<8x32xf32> to vector<8xf32>
    %97 = vector.shape_cast %96 : vector<8xf32> to vector<8x1xf32>
    %cst_34 = arith.constant 3.200000e+01 : f32
    %98 = vector.broadcast %cst_34 : f32 to vector<8x1xf32>
    %99 = arith.divf %97, %98 : vector<8x1xf32>
    %100 = vector.broadcast %92 : vector<8x1xf32> to vector<8x32xf32>
    %101 = arith.subf %86, %100 : vector<8x32xf32>
    %cst_35 = arith.constant 9.99999974E-6 : f32
    %102 = vector.broadcast %cst_35 : f32 to vector<8x1xf32>
    %103 = arith.addf %99, %102 : vector<8x1xf32>
    %104 = math.rsqrt %103 : vector<8x1xf32>
    %105 = vector.broadcast %104 : vector<8x1xf32> to vector<8x32xf32>
    %106 = arith.mulf %101, %105 : vector<8x32xf32>
    %107 = vector.broadcast %87 : vector<1x32xf32> to vector<8x32xf32>
    %108 = arith.mulf %106, %107 : vector<8x32xf32>
    %109 = vector.broadcast %88 : vector<1x32xf32> to vector<8x32xf32>
    %110 = arith.addf %108, %109 : vector<8x32xf32>
    %111 = arith.truncf %110 : vector<8x32xf32> to vector<8x32xbf16>
    %c0_36 = arith.constant 0 : index
    %c0_37 = arith.constant 0 : index
    %112 = vector.load %arg11[%c0_36, %c0_37] : memref<32x128xbf16, #tpu.memory_space<vmem>>, vector<32x128xbf16>
    %cst_38 = arith.constant dense<0.000000e+00> : vector<8x128xf32>
    %113 = tpu.matmul %111, %112, %cst_38 {dimension_numbers = #tpu.dot_dimension_numbers<[1], [0], [0], [1], [0, 0, 1, 1], [], []>} : vector<8x32xbf16>, vector<32x128xbf16>, vector<8x128xf32> -> vector<8x128xf32>
    %c0_39 = arith.constant 0 : index
    %c0_40 = arith.constant 0 : index
    %114 = vector.load %arg12[%c0_39, %c0_40] : memref<1x128xf32, #tpu.memory_space<vmem>>, vector<1x128xf32>
    %115 = vector.broadcast %114 : vector<1x128xf32> to vector<8x128xf32>
    %116 = arith.addf %113, %115 : vector<8x128xf32>
    %cst_41 = arith.constant 1.702000e+00 : f32
    %117 = vector.broadcast %cst_41 : f32 to vector<8x128xf32>
    %118 = arith.mulf %117, %116 : vector<8x128xf32>
    %119 = arith.negf %118 : vector<8x128xf32>
    %120 = math.exp %119 : vector<8x128xf32>
    %cst_42 = arith.constant 1.000000e+00 : f32
    %121 = vector.broadcast %cst_42 : f32 to vector<8x128xf32>
    %122 = arith.addf %121, %120 : vector<8x128xf32>
    %123 = arith.divf %121, %122 : vector<8x128xf32>
    %124 = arith.mulf %116, %123 : vector<8x128xf32>
    %125 = arith.truncf %124 : vector<8x128xf32> to vector<8x128xbf16>
    %c0_43 = arith.constant 0 : index
    %c0_44 = arith.constant 0 : index
    %126 = vector.load %arg13[%c0_43, %c0_44] : memref<128x32xbf16, #tpu.memory_space<vmem>>, vector<128x32xbf16>
    %cst_45 = arith.constant dense<0.000000e+00> : vector<8x32xf32>
    %127 = tpu.matmul %125, %126, %cst_45 {dimension_numbers = #tpu.dot_dimension_numbers<[1], [0], [0], [1], [0, 0, 1, 1], [], []>} : vector<8x128xbf16>, vector<128x32xbf16>, vector<8x32xf32> -> vector<8x32xf32>
    %c0_46 = arith.constant 0 : index
    %c0_47 = arith.constant 0 : index
    %128 = vector.load %arg14[%c0_46, %c0_47] : memref<1x32xf32, #tpu.memory_space<vmem>>, vector<1x32xf32>
    %129 = vector.broadcast %128 : vector<1x32xf32> to vector<8x32xf32>
    %130 = arith.addf %127, %129 : vector<8x32xf32>
    %131 = arith.addf %130, %86 : vector<8x32xf32>
    %c0_48 = arith.constant 0 : index
    %c0_49 = arith.constant 0 : index
    %132 = vector.load %arg15[%c0_48, %c0_49] : memref<8x32xf32, #tpu.memory_space<vmem>>, vector<8x32xf32>
    tpu.vector_store %arg15[%c0_48, %c0_49], %131 {strides = array<i32>} : memref<8x32xf32, #tpu.memory_space<vmem>>, vector<8x32xf32>,
    return
  }
  func.func @transform_0(%arg0: i32) -> (i32, i32) {
    %c0_i32 = arith.constant 0 : i32
    %c0_i32_0 = arith.constant 0 : i32
    return %arg0, %c0_i32 : i32, i32
  }
  func.func @transform_1(%arg0: i32) -> (i32, i32) {
    %c0_i32 = arith.constant 0 : i32
    %c0_i32_0 = arith.constant 0 : i32
    %c0_i32_1 = arith.constant 0 : i32
    return %c0_i32, %c0_i32_0 : i32, i32
  }
  func.func @transform_2(%arg0: i32) -> (i32, i32) {
    %c0_i32 = arith.constant 0 : i32
    %c0_i32_0 = arith.constant 0 : i32
    %c0_i32_1 = arith.constant 0 : i32
    return %c0_i32, %c0_i32_0 : i32, i32
  }
  func.func @transform_3(%arg0: i32) -> (i32, i32) {
    %c0_i32 = arith.constant 0 : i32
    %c0_i32_0 = arith.constant 0 : i32
    %c0_i32_1 = arith.constant 0 : i32
    return %c0_i32, %c0_i32_0 : i32, i32
  }
  func.func @transform_4(%arg0: i32) -> (i32, i32) {
    %c0_i32 = arith.constant 0 : i32
    %c0_i32_0 = arith.constant 0 : i32
    %c0_i32_1 = arith.constant 0 : i32
    return %c0_i32, %c0_i32_0 : i32, i32
  }
  func.func @transform_5(%arg0: i32) -> (i32, i32) {
    %c0_i32 = arith.constant 0 : i32
    %c0_i32_0 = arith.constant 0 : i32
    %c0_i32_1 = arith.constant 0 : i32
    return %c0_i32, %c0_i32_0 : i32, i32
  }
  func.func @transform_6(%arg0: i32) -> (i32, i32) {
    %c0_i32 = arith.constant 0 : i32
    %c0_i32_0 = arith.constant 0 : i32
    %c0_i32_1 = arith.constant 0 : i32
    return %c0_i32, %c0_i32_0 : i32, i32
  }
  func.func @transform_7(%arg0: i32) -> (i32, i32) {
    %c0_i32 = arith.constant 0 : i32
    %c0_i32_0 = arith.constant 0 : i32
    %c0_i32_1 = arith.constant 0 : i32
    return %c0_i32, %c0_i32_0 : i32, i32
  }
  func.func @transform_8(%arg0: i32) -> (i32, i32) {
    %c0_i32 = arith.constant 0 : i32
    %c0_i32_0 = arith.constant 0 : i32
    %c0_i32_1 = arith.constant 0 : i32
    return %c0_i32, %c0_i32_0 : i32, i32
  }
  func.func @transform_9(%arg0: i32) -> (i32, i32) {
    %c0_i32 = arith.constant 0 : i32
    %c0_i32_0 = arith.constant 0 : i32
    %c0_i32_1 = arith.constant 0 : i32
    return %c0_i32, %c0_i32_0 : i32, i32
  }
  func.func @transform_10(%arg0: i32) -> (i32, i32) {
    %c0_i32 = arith.constant 0 : i32
    %c0_i32_0 = arith.constant 0 : i32
    %c0_i32_1 = arith.constant 0 : i32
    return %c0_i32, %c0_i32_0 : i32, i32
  }
  func.func @transform_11(%arg0: i32) -> (i32, i32) {
    %c0_i32 = arith.constant 0 : i32
    %c0_i32_0 = arith.constant 0 : i32
    %c0_i32_1 = arith.constant 0 : i32
    return %c0_i32, %c0_i32_0 : i32, i32
  }
  func.func @transform_12(%arg0: i32) -> (i32, i32) {
    %c0_i32 = arith.constant 0 : i32
    %c0_i32_0 = arith.constant 0 : i32
    %c0_i32_1 = arith.constant 0 : i32
    return %c0_i32, %c0_i32_0 : i32, i32
  }
  func.func @transform_13(%arg0: i32) -> (i32, i32) {
    %c0_i32 = arith.constant 0 : i32
    %c0_i32_0 = arith.constant 0 : i32
    %c0_i32_1 = arith.constant 0 : i32
    return %c0_i32, %c0_i32_0 : i32, i32
  }
  func.func @transform_14(%arg0: i32) -> (i32, i32) {
    %c0_i32 = arith.constant 0 : i32
    %c0_i32_0 = arith.constant 0 : i32
    return %arg0, %c0_i32 : i32, i32
  }
}

</mosaic_0001>

<bundles_post_ra>
// kernel: tpu_custom_call.1
= control target key start
LH: loop header
LB: loop body
LE: loop exit
PB: predicated region body
PF: predicated region fallthrough
CT: control target
= control target key end

     0   :  { %s2080_s0 = inlined_call_operand.vmem [shape: f32[16,32], index: 0, kind: input, shape index: {}]   ;;  %s2081_s1 = inlined_call_operand.vmem [shape: f32[8,8], index: 1, kind: input, shape index: {}]   ;;  %s2082_s2 = inlined_call_operand.vmem [shape: f32[1,32], index: 2, kind: input, shape index: {}]   ;;  %s2083_s3 = inlined_call_operand.vmem [shape: f32[1,32], index: 3, kind: input, shape index: {}]   ;;  %s2084_s4 = inlined_call_operand.vmem [shape: bf16[32,96], index: 4, kind: input, shape index: {}]   ;;  %s2085_s5 = inlined_call_operand.vmem [shape: f32[1,96], index: 5, kind: input, shape index: {}]   ;;  %s2086_s6 = inlined_call_operand.vmem [shape: bf16[32,32], index: 6, kind: input, shape index: {}]   ;;  %s2087_s7 = inlined_call_operand.vmem [shape: f32[1,32], index: 7, kind: input, shape index: {}]   ;;  %s2088_s8 = inlined_call_operand.vmem [shape: f32[1,32], index: 8, kind: input, shape index: {}]   ;;  %s2089_s9 = inlined_call_operand.vmem [shape: f32[1,32], index: 9, kind: input, shape index: {}]   ;;  %s2090_s10 = inlined_call_operand.vmem [shape: bf16[32,128], index: 10, kind: input, shape index: {}]   ;;  %s2091_s11 = inlined_call_operand.vmem [shape: f32[1,128], index: 11, kind: input, shape index: {}]   ;;  %s2092_s12 = inlined_call_operand.vmem [shape: bf16[128,32], index: 12, kind: input, shape index: {}]   ;;  %s2093_s13 = inlined_call_operand.vmem [shape: f32[1,32], index: 13, kind: input, shape index: {}]   ;;  %s2094_s14 = inlined_call_operand.hbm [shape: f32[16,32], index: 14, kind: output, shape index: {}]  }
   0x1   :  { %2095 = sst [smem:[#allocation5_spill]] %s2080_s0 }
   0x2   :  { %2096 = sst [smem:[#allocation6_spill]] %s2081_s1 }
   0x3   :  { %2097 = sst [smem:[#allocation7_spill]] %s2082_s2 }
   0x4   :  { %2098 = sst [smem:[#allocation8_spill]] %s2083_s3 }
   0x5   :  { %19 = vsyncpa [#allocation3], 0 }
   0x6   :  { %21 = vsyncpa [#allocation3 + $0x1], 0  ;;  %s1808_s29 = smov 0   ;;  %s1810_s30 = smov 0  }
   0x7   :  { %s1812_s15 = smov 0   ;;  %s1814_s16 = smov 0  }
   0x8 LB: > { %s1829_s17 = sadd.s32 4294967295, %s1720_s16   ;;  %s1401_s18 = sadd.s32 4294967294, %s1720_s16   ;;  %s1720_s16 = sphi %s1814_s16, %s2108_s16   ;;  %s1716_s15 = sphi %s1812_s15, %s2107_s15   ;;  %s1712_s30 = sphi %s1810_s30, %s2106_s30   ;;  %s1708_s29 = sphi %s1808_s29, %s2105_s29  }
   0x9   : > { %s1833_s19 = sadd.s32 1, %s1720_s16   ;;  %s333_s20 = sadd.s32 1, %s1716_s15 }
   0xa   : > { %s330_s21 = ssub.s32 %s1720_s16, %s1833_s19  ;;  %p343_p0 = scmp.ne.s32.totalorder %s1716_s15, %s1712_s30 }
   0xb   : > { %p331_p1 = scmp.eq.s32.totalorder %s330_s21, 0  ;;  %p344_p2 = scmp.eq.s32.totalorder %s1829_s17, 1 }
   0xc   : > { %p349_p3 = scmp.ne.s32.totalorder %s1712_s30, %s1708_s29  ;;  %p350_p4 = scmp.eq.s32.totalorder %s1401_s18, 1 }
   0xd   : > { %s1844_s22 = scalar_select %p331_p1, %s1716_s15, %s333_s20  }
   0xe   : > { %p1846_p5 = por %p344_p2, %p343_p0  ;;  %p1850_p6 = por %p350_p4, %p349_p3 }
   0xf   : > { %p1404_p7 = scmp.ge.s32.totalorder %s1720_s16, 1  ;;  %p414_p8 = scmp.lt.s32.totalorder %s1720_s16, 3 }
  0x11   : > { %p415_p9 = pnand %p1404_p7, %p414_p8 }
  0x12   : > { %p459_p10 = scmp.lt.s32.totalorder (!%p415_p9), %s1829_s17, 1  ;;  %vm467_vm0 = vcmask (!%p415_p9), 261120   ;;  %s2101_s0 = sld [smem:[#allocation5_spill]] (!%p415_p9)  ;;  %v1620_v7 = vld [vmem:[%s2084_s4] sm:$0xff] (!%p415_p9)   ;;  %v1722_v8 = vmov (!%p415_p9), 0.0   ;;  %vm1723_vm1 = vmmov (!%p415_p9), 0  }
  0x13   : > { %418 = sbr.rel (%p415_p9) target bundleno = 2522 (0x9da), region = 76  ;;  %1479 = vmatprep.subr.bf16.mxu0 (!%p415_p9), %v1722_v8  ;;  %1483 = vmatprep.mubr.msk.bf16.mxu0 (!%p415_p9), %vm1723_vm1, %v1722_v8  ;;  %v1621_v9 = vld [vmem:[%s2084_s4 + $0x8] sm:$0xff] (!%p415_p9)   ;;  %s2102_s2 = sld [smem:[#allocation7_spill]] (!%p415_p9)  ;;  %v1409_v20 = vld [vmem:[%s2085_s5] ss:$0 sm:$0xff] (!%p415_p9)  ;;  %vm581_vm2 = vcmask (!%p415_p9), 64512  }
  0x14   : > { %1480 = vmatpush3.bf16.msra.mxu0 (!%p415_p9), %v1620_v7  ;;  %1499 = vmatprep.subr.bf16.mxu1 (!%p415_p9), %v1722_v8  ;;  %s2103_s3 = sld [smem:[#allocation8_spill]] (!%p415_p9)  ;;  %s1725_s27 = smov (!%p415_p9), 120   ;;  %vm828_vm3 = vcmask (!%p415_p9), 1043456   ;;  %vm1037_vm4 = vcmask (!%p415_p9), 130048   ;;  %vm1039_vm5 = vcmask (!%p415_p9), 195584  }
  0x15   : > { %1481 = vmatprep.subr.bf16.mxu0 (!%p415_p9), %v1722_v8  ;;  %1501 = vmatprep.mubr.msk.bf16.mxu1 (!%p415_p9), %vm1723_vm1, %v1722_v8  ;;  %s1726_s28 = smov (!%p415_p9), 112   ;;  %s1728_s20 = smov (!%p415_p9), 64  }
  0x16   : > { %s2104_s1 = sld [smem:[#allocation6_spill]] (!%p415_p9)  ;;  %s1730_s21 = smov (!%p415_p9), 16  }
  0x18   : > { %1482 = vmatpush3.bf16.msra.mxu0 (!%p415_p9), %v1621_v9 }
  0x19   : > { %1487 = vmatprep.subr.bf16.mxu0 (!%p415_p9), %v1722_v8  ;;  %v1407_v14 = vld [vmem:[%s2102_s2] ss:$0 sm:$0xff] (!%p415_p9) }
  0x1a   : > { %s460_s25 = scalar_select %p459_p10, %s1829_s17, 1  ;;  %v1408_v16 = vld [vmem:[%s2103_s3] ss:$0 sm:$0xff] }
  0x1c   : > { %s1406_s26 = sshll.u32 %s460_s25, 3  ;;  %v577_v43 = vld [vmem:[%s2104_s1] sm:$0xff]  ;;  %s1731_s25 = smov 24  }
  0x1d   : > { %s462_s18 = scalar_lea.vmem %s2101_s0, %s1406_s26  ;;  %s1724_s26 = smov 104  }
  0x1e   : > { %v1861_v0 = vld [vmem:[%s462_s18] sm:$0xff]  ;;  %s1727_s18 = smov 96  }
  0x1f   : > { %v468_v1 = vsel %vm467_vm0, %v1861_v0, 0.0 }
  0x20   : > { %469 = vadd.xlane.f32.xlu0 %v468_v1 }
  0xad   : > { %v470_v2 = vpop.xlane.xlu0 %469 }
  0xae   : > { %v472_v3 = vmul.f32 0.03125, %v470_v2 }
  0xb0   : > { %v473_v4 = vsub.f32 %v1861_v0, %v472_v3 }
  0xb2   : > { %v474_v5 = vmul.f32 %v473_v4, %v473_v4 }
  0xb4   : > { %v475_v6 = vsel %vm467_vm0, %v474_v5, 0.0 }
  0xb5   : > { %476 = vadd.xlane.f32.xlu0 %v475_v6 }
 0x142   : > { %v477_v10 = vpop.xlane.xlu0 %476 }
 0x143   : > { %v478_v11 = vmul.f32 0.03125, %v477_v10 }
 0x145   : > { %v479_v12 = vadd.f32 1e-05, %v478_v11 }
 0x147   : > { %1634 = vrsqrt.f32 %v479_v12 }
 0x151   : > { %v1635_v13 = vpop.eup %1634 }
 0x152   : > { %v481_v15 = vmul.f32 %v1635_v13, %v473_v4 }
 0x154   : > { %v488_v17 = vmul.f32 %v1407_v14, %v481_v15 }
 0x156   : > { %v495_v18 = vadd.f32 %v1408_v16, %v488_v17 }
 0x158   : > { %v496_v19 = vpack.c.bf16 %v495_v18, %v495_v18 }
 0x15a   : > { %1484 = vmatmul.mubr.msk.bf16.vlgmr.msra.gmra.mrb[0].mxu0 %vm467_vm0, %v496_v19 }
 0x15b   : > { %1489 = vmatprep.mubr.msk.bf16.mxu0 %vm1723_vm1, %v1722_v8 }
 0x22d   : > { %v557_v21 = vpop.f32.mrb[0].mxu0 }
 0x22e   : > { %v558_v22 = vadd.f32 %v1409_v20, %v557_v21  ;;  %v1485_v23 = vpop.f32.mrb[1].mxu0 }
 0x22f   : > { %v560_v24 = vpop.f32.mrb[2].mxu0 }
 0x230   : > { %570 = vrot.lane.b32.xlu0 %v558_v22, %s1724_s26  ;;  %564 = vrot.lane.b32.xlu1 %v558_v22, %s1725_s27  ;;  %v1486_v25 = vpop.f32.mrb[3].mxu0  ;;  %v573_v26 = vpack.c.bf16 %v558_v22, %v558_v22  ;;  %s1732_s26 = smov [#allocation2]  }
 0x231   : > { %s1662_s27 = sshll.u32 %s1732_s26, 4  ;;  %s1663_s27 = int_to_ptr.vmem [resolvable:$false] %s1662_s27 }
 0x232   : > { %s1664_s3 = scalar_lea.vmem %s1663_s27, 256 }
 0x234   : > { %567 = vrot.lane.b32.xlu1 %v558_v22, %s1726_s28  ;;  %s1442_s28 = sshll.u32 %s1829_s17, 7 }
 0x235   : > { %s2037_s2 = scalar_lea.hbm %s2094_s14, %s1442_s28 }
 0x238   : > { %579 = vrot.lane.b32.xlu1 %v573_v26, %s1727_s18 }
 0x2a2   : > { %v565_v27 = vpop.permute.xlu1 %564  ;;  %v571_v31 = vpop.permute.xlu0 %570 }
 0x2a3   : > { %v1893_v28 = vpack.c.bf16 %v565_v27, %v565_v27  ;;  %v576_v33 = vpack.c.bf16 %v571_v31, %v571_v31 }
 0x2a5   : > { %629 = vrot.lane.b32.xlu1 %v1893_v28, %s1727_s18 }
 0x2a6   : > { %v568_v29 = vpop.permute.xlu1 %567 }
 0x2a7   : > { %v1896_v30 = vpack.c.bf16 %v568_v29, %v568_v29 }
 0x2a9   : > { %678 = vrot.lane.b32.xlu1 %v1896_v30, %s1727_s18 }
 0x2aa   : > { %v580_v32 = vpop.permute.xlu1 %579 }
 0x2ab   : > { %v586_v34 = vsel %vm581_vm2, %v580_v32, 0 }
 0x2ac   : > { %1488 = vmatpush3.bf16.xpose.msra.mxu0 %v586_v34 }
 0x2ad   : > { %727 = vrot.lane.b32.xlu1 %v576_v33, %s1727_s18  ;;  %1493 = vmatprep.subr.bf16.mxu0 %v1722_v8 }
 0x2b1   : > { %823 = vrot.lane.b32.xlu1 %v573_v26, %s1728_s20 }
 0x2b3   : > { %1490 = vmatmul.mubr.msk.bf16.vlgmr.msra.gmra.mrb[4].mxu0 %vm581_vm2, %v573_v26 }
 0x2b4   : > { %1495 = vmatprep.mubr.msk.bf16.mxu0 %vm1723_vm1, %v1722_v8 }
 0x317   : > { %v630_v35 = vpop.permute.xlu1 %629 }
 0x318   : > { %v635_v36 = vsel %vm581_vm2, %v630_v35, 0 }
 0x319   : > { %1494 = vmatpush3.bf16.xpose.msra.mxu0 %v635_v36 }
 0x31a   : > { %1505 = vmatprep.subr.bf16.mxu0 %v1722_v8 }
 0x31b   : > { %v679_v37 = vpop.permute.xlu1 %678 }
 0x31c   : > { %v684_v38 = vsel %vm581_vm2, %v679_v37, 0 }
 0x31d   : > { %1500 = vmatpush3.bf16.xpose.msra.mxu1 %v684_v38 }
 0x31e   : > { %1511 = vmatprep.subr.bf16.mxu1 %v1722_v8 }
 0x31f   : > { %v728_v39 = vpop.permute.xlu1 %727 }
 0x320   : > { %v733_v40 = vsel %vm581_vm2, %v728_v39, 0  ;;  %1496 = vmatmul.mubr.msk.bf16.vlgmr.msra.gmra.mrb[8].mxu0 %vm581_vm2, %v1893_v28 }
 0x321   : > { %1506 = vmatpush3.bf16.xpose.msra.mxu0 %v733_v40  ;;  %1507 = vmatprep.mubr.msk.bf16.mxu0 %vm1723_vm1, %v1722_v8 }
 0x322   : > { %1517 = vmatprep.subr.bf16.mxu0 %v1722_v8 }
 0x323   : > { %v824_v41 = vpop.permute.xlu1 %823 }
 0x324   : > { %v830_v42 = vsel %vm828_vm3, %v824_v41, 0  ;;  %1502 = vmatmul.mubr.msk.bf16.vlgmr.msra.gmra.mrb[0].mxu1 %vm581_vm2, %v1896_v30 }
 0x325   : > { %1512 = vmatpush3.bf16.msra.mxu1 %v830_v42  ;;  %1513 = vmatprep.mubr.msk.bf16.mxu1 %vm1723_vm1, %v1722_v8 }
 0x326   : > { %1523 = vmatprep.subr.bf16.mxu1 %v1722_v8 }
 0x328   : > { %1508 = vmatmul.mubr.msk.bf16.vlgmr.msra.gmra.mrb[12].mxu0 %vm581_vm2, %v576_v33 }
 0x329   : > { %1519 = vmatprep.mubr.msk.bf16.mxu0 %vm1723_vm1, %v1722_v8 }
 0x386   : > { %v622_v44 = vpop.f32.mrb[4].mxu0 }
 0x387   : > { %v623_v45 = vadd.f32 %v622_v44, %v577_v43  ;;  %v1491_v46 = vpop.f32.mrb[5].mxu0 }
 0x388   : > { %v625_v47 = vpop.f32.mrb[6].mxu0  ;;  %v1622_v46 = vld [vmem:[%s2086_s6] sm:$0xff]  }
 0x389   : > { %v1492_v48 = vpop.f32.mrb[7].mxu0  ;;  %v775_v49 = vsel %vm581_vm2, %v623_v45, -inf }
 0x38a   : > { %776 = vmax.xlane.f32.xlu1 %v775_v49  ;;  %v1623_v48 = vld [vmem:[%s2086_s6 + $0x8] sm:$0xff]  }
 0x3f3   : > { %v671_v50 = vpop.f32.mrb[8].mxu0 }
 0x3f4   : > { %v672_v51 = vadd.f32 %v671_v50, %v577_v43  ;;  %v1497_v52 = vpop.f32.mrb[9].mxu0 }
 0x3f5   : > { %v674_v53 = vpop.f32.mrb[10].mxu0 }
 0x3f6   : > { %v1498_v54 = vpop.f32.mrb[11].mxu0  ;;  %v778_v55 = vsel %vm581_vm2, %v672_v51, -inf }
 0x3f7   : > { %v720_v56 = vpop.f32.mrb[0].mxu1  ;;  %779 = vmax.xlane.f32.xlu0 %v778_v55 }
 0x3f8   : > { %v721_v57 = vadd.f32 %v720_v56, %v577_v43  ;;  %v1503_v58 = vpop.f32.mrb[1].mxu1 }
 0x3f9   : > { %v723_v59 = vpop.f32.mrb[2].mxu1 }
 0x3fa   : > { %v1504_v60 = vpop.f32.mrb[3].mxu1  ;;  %v781_v61 = vsel %vm581_vm2, %v721_v57, -inf }
 0x3fb   : > { %782 = vmax.xlane.f32.xlu1 %v781_v61  ;;  %v769_v62 = vpop.f32.mrb[12].mxu0 }
 0x3fc   : > { %v770_v63 = vadd.f32 %v769_v62, %v577_v43  ;;  %v1509_v1 = vpop.f32.mrb[13].mxu0 }
 0x3fd   : > { %v772_v2 = vpop.f32.mrb[14].mxu0 }
 0x3fe   : > { %v1510_v3 = vpop.f32.mrb[15].mxu0  ;;  %v784_v4 = vsel %vm581_vm2, %v770_v63, -inf }
 0x3ff   : > { %785 = vmax.xlane.f32.xlu0 %v784_v4 }
 0x40c   : > { %920 = vrot.lane.b32.xlu1 %v1896_v30, %s1728_s20 }
 0x410   : > { %968 = vrot.lane.b32.xlu1 %v576_v33, %s1728_s20 }
 0x415   : > { %872 = vrot.lane.b32.xlu0 %v1893_v28, %s1728_s20  ;;  %s1729_s20 = smov 8  }
 0x417   : > { %v777_v5 = vpop.xlane.xlu1 %776 }
 0x418   : > { %v787_v6 = vsub.f32 %v623_v45, %v777_v5 }
 0x41a   : > { %v791_v7 = vpack.c.bf16 %v787_v6, %v787_v6 }
 0x41c   : > { %v796_v9 = vmul.bf16 1069105081, %v791_v7 }
 0x41e   : > { %1636 = vpow.bf16 %v796_v9 }
 0x429   : > { %v1637_v10 = vpop.eup %1636 }
 0x42a   : > { %1514 = vmatmul.mubr.msk.bf16.vlgmr.msra.gmra.mrb[4].mxu1 %vm581_vm2, %v1637_v10  ;;  %v807_v38 = vunpack.c.l.bf16 %v1637_v10 }
 0x42b   : > { %1525 = vmatprep.mubr.msk.bf16.mxu1 %vm1723_vm1, %v1722_v8 }
 0x42c   : > { %v811_v39 = vsel %vm581_vm2, %v807_v38, 0.0 }
 0x484   : > { %v780_v11 = vpop.xlane.xlu0 %779 }
 0x485   : > { %v788_v12 = vsub.f32 %v672_v51, %v780_v11 }
 0x487   : > { %v792_v13 = vpack.c.bf16 %v788_v12, %v788_v12 }
 0x488   : > { %v783_v14 = vpop.xlane.xlu1 %782 }
 0x489   : > { %v799_v15 = vmul.bf16 1069105081, %v792_v13  ;;  %v789_v16 = vsub.f32 %v721_v57, %v783_v14 }
 0x48b   : > { %1638 = vpow.bf16 %v799_v15  ;;  %v793_v17 = vpack.c.bf16 %v789_v16, %v789_v16  ;;  %v1421_v15 = vld [vmem:[%s2087_s7] ss:$0 sm:$0xff] }
 0x48c   : > { %v921_v18 = vpop.permute.xlu1 %920  ;;  %v786_v19 = vpop.xlane.xlu0 %785 }
 0x48d   : > { %v802_v20 = vmul.bf16 1069105081, %v793_v17  ;;  %v926_v21 = vsel %vm828_vm3, %v921_v18, 0  ;;  %v790_v22 = vsub.f32 %v770_v63, %v786_v19 }
 0x48e   : > { %1524 = vmatpush3.bf16.msra.mxu1 %v926_v21 }
 0x48f   : > { %1640 = vpow.bf16 %v802_v20  ;;  %v794_v23 = vpack.c.bf16 %v790_v22, %v790_v22  ;;  %1535 = vmatprep.subr.bf16.mxu1 %v1722_v8 }
 0x490   : > { %v873_v24 = vpop.permute.xlu0 %872  ;;  %v969_v27 = vpop.permute.xlu1 %968 }
 0x491   : > { %v805_v25 = vmul.bf16 1069105081, %v794_v23  ;;  %v878_v26 = vsel %vm828_vm3, %v873_v24, 0  ;;  %v974_v29 = vsel %vm828_vm3, %v969_v27, 0 }
 0x492   : > { %1518 = vmatpush3.bf16.msra.mxu0 %v878_v26 }
 0x493   : > { %1642 = vpow.bf16 %v805_v25  ;;  %1529 = vmatprep.subr.bf16.mxu0 %v1722_v8 }
 0x496   : > { %v1639_v28 = vpop.eup %1638 }
 0x497   : > { %1520 = vmatmul.mubr.msk.bf16.vlgmr.msra.gmra.mrb[16].mxu0 %vm581_vm2, %v1639_v28  ;;  %v808_v30 = vunpack.c.l.bf16 %v1639_v28  ;;  %v1624_v28 = vld [vmem:[%s2090_s10] sm:$0xff]  }
 0x498   : > { %1530 = vmatpush3.bf16.msra.mxu0 %v974_v29  ;;  %1531 = vmatprep.mubr.msk.bf16.mxu0 %vm1723_vm1, %v1722_v8 }
 0x499   : > { %v814_v31 = vsel %vm581_vm2, %v808_v30, 0.0  ;;  %1543 = vmatprep.subr.bf16.mxu0 %v1722_v8 }
 0x49a   : > { %v1641_v32 = vpop.eup %1640  ;;  %815 = vadd.xlane.f32.xlu0 %v814_v31 }
 0x49b   : > { %1526 = vmatmul.mubr.msk.bf16.vlgmr.msra.gmra.mrb[8].mxu1 %vm581_vm2, %v1641_v32  ;;  %v809_v33 = vunpack.c.l.bf16 %v1641_v32 }
 0x49c   : > { %1539 = vmatprep.mubr.msk.bf16.mxu1 %vm1723_vm1, %v1722_v8  ;;  %1536 = vmatpush3.bf16.msra.mxu1 %v1622_v46  ;;  %v1633_v46 = vld [vmem:[%s2092_s12 + $0x38] sm:$0xff]  }
 0x49d   : > { %v817_v34 = vsel %vm581_vm2, %v809_v33, 0.0  ;;  %1537 = vmatprep.subr.bf16.mxu1 %v1722_v8  ;;  %v1425_v33 = vld [vmem:[%s2088_s8] ss:$0 sm:$0xff] }
 0x49e   : > { %v1643_v35 = vpop.eup %1642  ;;  %818 = vadd.xlane.f32.xlu1 %v817_v34 }
 0x49f   : > { %1532 = vmatmul.mubr.msk.bf16.vlgmr.msra.gmra.mrb[20].mxu0 %vm581_vm2, %v1643_v35  ;;  %v810_v36 = vunpack.c.l.bf16 %v1643_v35  ;;  %v1426_v35 = vld [vmem:[%s2089_s9] ss:$0 sm:$0xff] }
 0x4a0   : > { %1547 = vmatprep.mubr.msk.bf16.mxu0 %vm1723_vm1, %v1722_v8  ;;  %1538 = vmatpush3.bf16.msra.mxu1 %v1623_v48 }
 0x4a1   : > { %v820_v37 = vsel %vm581_vm2, %v810_v36, 0.0  ;;  %1551 = vmatprep.subr.bf16.mxu1 %v1722_v8  ;;  %1544 = vmatpush3.bf16.msra.mxu0 %v1624_v28 }
 0x4a2   : > { %821 = vadd.xlane.f32.xlu0 %v820_v37  ;;  %1545 = vmatprep.subr.bf16.mxu0 %v1722_v8 }
 0x4a6   : > { %812 = vadd.xlane.f32.xlu0 %v811_v39  ;;  %v1626_v39 = vld [vmem:[%s2092_s12] sm:$0xff]  }
 0x4fd   : > { %v866_v40 = vpop.f32.mrb[4].mxu1 }
 0x4fe   : > { %v1515_v41 = vpop.f32.mrb[5].mxu1 }
 0x4ff   : > { %v869_v42 = vpop.f32.mrb[6].mxu1  ;;  %v1628_v41 = vld [vmem:[%s2092_s12 + $0x10] sm:$0xff]  }
 0x500   : > { %v1516_v43 = vpop.f32.mrb[7].mxu1  ;;  %v1629_v42 = vld [vmem:[%s2092_s12 + $0x18] sm:$0xff]  }
 0x501   : > { %v1630_v43 = vld [vmem:[%s2092_s12 + $0x20] sm:$0xff]  }
 0x527   : > { %v816_v44 = vpop.xlane.xlu0 %815 }
 0x528   : > { %1644 = vrcp.f32 %v816_v44  ;;  %v1631_v44 = vld [vmem:[%s2092_s12 + $0x28] sm:$0xff]  }
 0x52b   : > { %v819_v45 = vpop.xlane.xlu1 %818 }
 0x52c   : > { %1646 = vrcp.f32 %v819_v45  ;;  %v1632_v45 = vld [vmem:[%s2092_s12 + $0x30] sm:$0xff]  }
 0x52f   : > { %v822_v47 = vpop.xlane.xlu0 %821 }
 0x530   : > { %1648 = vrcp.f32 %v822_v47  ;;  %v1427_v47 = vld [vmem:[%s2091_s11] ss:$0 sm:$0xff] }
 0x532   : > { %v1645_v49 = vpop.eup %1644 }
 0x533   : > { %v813_v4 = vpop.xlane.xlu0 %812 }
 0x534   : > { %1650 = vrcp.f32 %v813_v4 }
 0x536   : > { %v1647_v55 = vpop.eup %1646 }
 0x53a   : > { %v1649_v61 = vpop.eup %1648 }
 0x53e   : > { %v1651_v5 = vpop.eup %1650 }
 0x53f   : > { %v1020_v7 = vmul.f32 %v1651_v5, %v866_v40  ;;  %v1627_v40 = vld [vmem:[%s2092_s12 + $0x8] sm:$0xff]  }
 0x56a   : > { %v914_v50 = vpop.f32.mrb[16].mxu0 }
 0x56b   : > { %v1021_v51 = vmul.f32 %v1645_v49, %v914_v50  ;;  %v1521_v52 = vpop.f32.mrb[17].mxu0 }
 0x56c   : > { %v917_v53 = vpop.f32.mrb[18].mxu0 }
 0x56d   : > { %1025 = vrot.lane.b32.xlu1 %v1021_v51, %s1729_s20  ;;  %v1522_v54 = vpop.f32.mrb[19].mxu0 }
 0x56e   : > { %v962_v56 = vpop.f32.mrb[8].mxu1 }
 0x56f   : > { %v1022_v57 = vmul.f32 %v1647_v55, %v962_v56  ;;  %v1527_v58 = vpop.f32.mrb[9].mxu1 }
 0x570   : > { %v965_v59 = vpop.f32.mrb[10].mxu1 }
 0x571   : > { %v1528_v60 = vpop.f32.mrb[11].mxu1  ;;  %1029 = vrot.lane.b32.xlu0 %v1022_v57, %s1730_s21  ;;  %v1432_v59 = vld [vmem:[%s2093_s13] ss:$0 sm:$0xff] }
 0x572   : > { %v1010_v62 = vpop.f32.mrb[20].mxu0 }
 0x573   : > { %v1023_v63 = vmul.f32 %v1649_v61, %v1010_v62  ;;  %v1533_v1 = vpop.f32.mrb[21].mxu0 }
 0x574   : > { %v1013_v2 = vpop.f32.mrb[22].mxu0 }
 0x575   : > { %1033 = vrot.lane.b32.xlu1 %v1023_v63, %s1731_s25  ;;  %v1534_v3 = vpop.f32.mrb[23].mxu0  ;;  %s456_s25 = sand.u32 1, %s1712_s30  }
 0x576   : > { %s1405_s0 = sshll.u32 %s456_s25, 3  ;;  %s1329_s17 = scalar_lea.sflag [#allocation3], %s456_s25 }
 0x577   : > { %s458_s18 = scalar_lea.vmem [#allocation2], %s1405_s0 }
 0x578   : > { %s1342_s20 = sshll.u32 %s458_s18, 4  ;;  %s2039_s20 = int_to_ptr.vmem [resolvable:$true] %s1342_s20 }
 0x579   : > { %s1658_s0 = scalar_lea.vmem %s2039_s20, 128  ;;  %p1665_p0 = scmp.lt.s32.totalorder %s2039_s20, %s1663_s27 }
 0x57a   : > { %p1659_p11 = scmp.ne.s32.totalorder %s2039_s20, %s1658_s0  ;;  %p1666_p1 = scmp.lt.s32.totalorder %s1664_s3, %s1658_s0 }
 0x57c   : > { %p1660_p12 = pnand %p1659_p11, %p1846_p5  ;;  %p1667_p2 = por %p1666_p1, %p1665_p0 }
 0x57e   : > { %p1661_p13 = pneg %p1660_p12 }
 0x580   : > { %p1668_p3 = pnand %p1667_p2, %p1661_p13 }
 0x5df   : > { %v1026_v6 = vpop.permute.xlu1 %1025 }
 0x5e0   : > { %v1036_v10 = vsel %vm581_vm2, %v1020_v7, %v1026_v6 }
 0x5e3   : > { %v1030_v9 = vpop.permute.xlu0 %1029 }
 0x5e4   : > { %v1038_v11 = vsel %vm1037_vm4, %v1036_v10, %v1030_v9 }
 0x5e7   : > { %v1034_v12 = vpop.permute.xlu1 %1033 }
 0x5e8   : > { %v1040_v13 = vsel %vm1039_vm5, %v1038_v11, %v1034_v12 }
 0x5e9   : > { %v1041_v14 = vpack.c.bf16 %v1040_v13, %v1040_v13 }
 0x5eb   : > { %1540 = vmatmul.mubr.msk.bf16.vlgmr.msra.gmra.mrb[12].mxu1 %vm467_vm0, %v1041_v14 }
 0x5ec   : > { %1567 = vmatprep.mubr.msk.bf16.mxu1 %vm1723_vm1, %v1722_v8  ;;  %1552 = vmatpush3.bf16.msra.mxu1 %v1626_v39 }
 0x5ed   : > { %1553 = vmatprep.subr.bf16.mxu1 %v1722_v8 }
 0x5f0   : > { %1554 = vmatpush3.bf16.msra.mxu1 %v1627_v40 }
 0x5f1   : > { %1555 = vmatprep.subr.bf16.mxu1 %v1722_v8 }
 0x5f4   : > { %1556 = vmatpush3.bf16.msra.mxu1 %v1628_v41 }
 0x5f5   : > { %1557 = vmatprep.subr.bf16.mxu1 %v1722_v8 }
 0x5f8   : > { %1558 = vmatpush3.bf16.msra.mxu1 %v1629_v42 }
 0x5f9   : > { %1559 = vmatprep.subr.bf16.mxu1 %v1722_v8 }
 0x5fc   : > { %1560 = vmatpush3.bf16.msra.mxu1 %v1630_v43 }
 0x5fd   : > { %1561 = vmatprep.subr.bf16.mxu1 %v1722_v8 }
 0x600   : > { %1562 = vmatpush3.bf16.msra.mxu1 %v1631_v44 }
 0x601   : > { %1563 = vmatprep.subr.bf16.mxu1 %v1722_v8 }
 0x604   : > { %1564 = vmatpush3.bf16.msra.mxu1 %v1632_v45 }
 0x605   : > { %1565 = vmatprep.subr.bf16.mxu1 %v1722_v8 }
 0x608   : > { %1566 = vmatpush3.bf16.msra.mxu1 %v1633_v46 }
 0x6be   : > { %v1102_v16 = vpop.f32.mrb[12].mxu1 }
 0x6bf   : > { %v1103_v17 = vadd.f32 %v1421_v15, %v1102_v16  ;;  %v1541_v18 = vpop.f32.mrb[13].mxu1 }
 0x6c0   : > { %v1105_v19 = vpop.f32.mrb[14].mxu1 }
 0x6c1   : > { %v1974_v20 = vadd.f32 %v1103_v17, %v1861_v0  ;;  %v1542_v21 = vpop.f32.mrb[15].mxu1  ;;  %v1625_v0 = vld [vmem:[%s2090_s10 + $0x8] sm:$0xff]  }
 0x6c2   : > { %1546 = vmatpush3.bf16.msra.mxu0 %v1625_v0 }
 0x6c3   : > { %v1112_v22 = vsel %vm467_vm0, %v1974_v20, 0.0 }
 0x6c4   : > { %1113 = vadd.xlane.f32.xlu1 %v1112_v22 }
 0x751   : > { %v1114_v23 = vpop.xlane.xlu1 %1113 }
 0x752   : > { %v1115_v24 = vmul.f32 0.03125, %v1114_v23 }
 0x754   : > { %v1116_v25 = vsub.f32 %v1974_v20, %v1115_v24 }
 0x756   : > { %v1117_v26 = vmul.f32 %v1116_v25, %v1116_v25 }
 0x758   : > { %v1118_v27 = vsel %vm467_vm0, %v1117_v26, 0.0 }
 0x759   : > { %1119 = vadd.xlane.f32.xlu0 %v1118_v27 }
 0x7e6   : > { %v1120_v29 = vpop.xlane.xlu0 %1119 }
 0x7e7   : > { %v1121_v30 = vmul.f32 0.03125, %v1120_v29 }
 0x7e9   : > { %v1122_v31 = vadd.f32 1e-05, %v1121_v30 }
 0x7eb   : > { %1652 = vrsqrt.f32 %v1122_v31 }
 0x7f5   : > { %v1653_v32 = vpop.eup %1652 }
 0x7f6   : > { %v1124_v34 = vmul.f32 %v1653_v32, %v1116_v25 }
 0x7f8   : > { %v1131_v36 = vmul.f32 %v1425_v33, %v1124_v34 }
 0x7fa   : > { %v1138_v37 = vadd.f32 %v1426_v35, %v1131_v36 }
 0x7fc   : > { %v1139_v38 = vpack.c.bf16 %v1138_v37, %v1138_v37 }
 0x7fe   : > { %1548 = vmatmul.mubr.msk.bf16.vlgmr.msra.gmra.mrb[24].mxu0 %vm467_vm0, %v1139_v38 }
 0x8d1   : > { %v1200_v48 = vpop.f32.mrb[24].mxu0 }
 0x8d2   : > { %v1201_v49 = vadd.f32 %v1427_v47, %v1200_v48  ;;  %v1549_v50 = vpop.f32.mrb[25].mxu0 }
 0x8d3   : > { %v1203_v51 = vpop.f32.mrb[26].mxu0 }
 0x8d4   : > { %v1431_v52 = vmul.f32 -1.702, %v1201_v49  ;;  %v1550_v53 = vpop.f32.mrb[27].mxu0 }
 0x8d6   : > { %v1208_v54 = vmul.f32 1.442695, %v1431_v52 }
 0x8d8   : > { %1654 = vpow2.f32 %v1208_v54 }
 0x8e2   : > { %v1655_v8 = vpop.eup %1654 }
 0x8e3   : > { %v1210_v55 = vadd.f32 1.0, %v1655_v8 }
 0x8e5   : > { %1656 = vrcp.f32 %v1210_v55 }
 0x8ef   : > { %v1657_v56 = vpop.eup %1656 }
 0x8f0   : > { %v1213_v57 = vmul.f32 %v1657_v56, %v1201_v49 }
 0x8f2   : > { %v1214_v58 = vpack.c.bf16 %v1213_v57, %v1213_v57 }
 0x8f4   : > { %1568 = vmatmul.mubr.bf16.vlgmr.msra.gmra.mrb[16].mxu1 %v1214_v58 }
 0x9c7   : > { %v1320_v60 = vpop.f32.mrb[16].mxu1 }
 0x9c8   : > { %v1321_v61 = vadd.f32 %v1432_v59, %v1320_v60  ;;  %v1569_v62 = vpop.f32.mrb[17].mxu1 }
 0x9c9   : > { %v1323_v63 = vpop.f32.mrb[18].mxu1 }
 0x9ca   : > { %v1326_v1 = vadd.f32 %v1321_v61, %v1974_v20  ;;  %v1570_v2 = vpop.f32.mrb[19].mxu1 }
 0x9cc   : > { %1327 = vst.msk [vmem:[%s458_s18] sm:$0xff] %vm467_vm0, %v1326_v1 }
 0x9cd   : > { %1671 = shalt.err (!%p1668_p3)
}
 0x9ce   : > { %s1672_s1 = scalar_lea.hbm %s2037_s2, 128  ;;  %s1676_s18 = scalar_lea.hbm %s2094_s14, 256 }
 0x9cf   : > { %p1673_p4 = scmp.ne.s32.totalorder %s2037_s2, %s1672_s1  ;;  %p1677_p9 = scmp.lt.u32.totalorder %s2037_s2, %s2094_s14 }
 0x9d0   : > { %p1678_p10 = scmp.lt.u32.totalorder %s1676_s18, %s1672_s1  ;;  %p1680_p12 = scmp.lt.u32.totalorder %s1672_s1, %s2037_s2 }
 0x9d1   : > { %p1674_p7 = pnand %p1673_p4, %p1846_p5 }
 0x9d2   : > { %p1679_p11 = por %p1678_p10, %p1677_p9 }
 0x9d3   : > { %p1675_p8 = pneg %p1674_p7 }
 0x9d4   : > { %p1681_p13 = por %p1680_p12, %p1679_p11 }
 0x9d6   : > { %p1682_p0 = pnand %p1681_p13, %p1675_p8 }
 0x9d8   : > { %1685 = shalt.err (!%p1682_p0)
}
 0x9d9   : > { %1571 = dma.vmem_to_hbm [thread:$0]  (%p1846_p5), %s2039_s20, 128, %s2037_s2, %s1329_s17  }
 0x9da PF: > { %p1577_p1 = scmp.ge.s32.totalorder %s1720_s16, 2  ;;  %s1354_s3 = sand.u32 1, %s1708_s29  }
 0x9db   : > { %s1355_s0 = scalar_lea.sflag [#allocation3], %s1354_s3 }
 0x9dc   : > { %p1574_p2 = pnand %p1577_p1, %p1850_p6 }
 0x9de   : > { %1703 = dma.done.wait (!%p1574_p2), %s1355_s0, 128  }
 0x9df   : > { %1705 = vsyncadd (!%p1574_p2), %s1355_s0, 4294967168  ;;  %p24_p3 = scmp.ge.s32.totalorder %s1833_s19, 4   ;;  %s2105_s29 = smov %s1712_s30 }
 0x9e0   : > { %s2106_s30 = smov %s1716_s15  ;;  %s2107_s15 = smov %s1844_s22 }
 0x9e1   : > { %s2108_s16 = smov %s1833_s19  ;;  %26 = sbr.rel (!%p24_p3) target bundleno = 8 (0x8), region = 111 }
 0x9e8   :  { %1360 = vsyncpa [#allocation3], 1 }
 0x9e9   :  { %1362 = vsyncpa [#allocation3 + $0x1], 1 }

</bundles_post_ra>
